<compile_context>
chip_gen: v7x
topology: tpu7x:2x2x1
jax: 0.10.0
libtpu: 0.0.40
codegen_flags: <defaults>
</compile_context>

<pallas_src>
import functools

import jax
import jax.numpy as jnp
from jax.experimental import pallas as pl
from jax.experimental.pallas import tpu as pltpu

NC = 10              # number of classes == embedding dim (Linear expects 784 + 10)
IMG_FEATS = 28 * 28  # 784


def disc_kernel(x_ref, cls_ref, w_ref, o_ref):
    # x_ref:   (tile_B, 784) f32/bf16 VMEM  -- image tile (pipelined over grid)
    # cls_ref: (tile_B, 1)   f32 VMEM       -- per-row folded label term + bias
    # w_ref:   (1, 784)      f32 VMEM       -- image part of the linear weight
    # o_ref:   (tile_B, 1)   f32 VMEM
    x = x_ref[...].astype(jnp.float32)
    w = w_ref[...]                                        # (1, 784), sublane-broadcast
    # VPU multiply + lane reduce instead of a 1-column MXU matmul.
    dotp = jnp.sum(x * w, axis=-1, keepdims=True)         # (tile_B, 1)
    o_ref[...] = jax.nn.sigmoid(dotp + cls_ref[...])


def _round_up(n, m):
    return ((n + m - 1) // m) * m


@functools.partial(jax.jit, static_argnames=("stream_bf16",))
def discriminator_forward(x, c, emb_weight, lin_weight, lin_bias, *, stream_bf16=False):
    """x: (B, 1, 28, 28) f32 NCHW; c: (B,) int; returns (B, 1, 1) f32."""
    B = x.shape[0]
    in_dtype = jnp.bfloat16 if stream_bf16 else jnp.float32
    x_flat = x.reshape(B, -1).astype(in_dtype)                     # (B, 784)

    # Split the Linear weight and fold the embedding path into a 10-entry table:
    #   logit = x @ W_img.T + (E @ W_emb.T)[c] + b
    w_img = lin_weight[:, :IMG_FEATS].astype(jnp.float32)          # (1, 784) row vector
    w_emb = lin_weight[:, IMG_FEATS:].astype(jnp.float32)          # (1, NC)
    cls_table = (emb_weight.astype(jnp.float32) @ w_emb.T).reshape(NC)
    cls_table = cls_table + lin_bias.astype(jnp.float32).reshape(())
    cls_rows = cls_table[c]                                        # (B,) f32 gather (tiny)

    # Batch tiling: big tiles for DMA/compute overlap; pad B to a tile multiple
    # so every grid step is on the aligned, unmasked path.
    tile_b = 512 if B >= 512 else _round_up(B, 8)
    n_tiles = pl.cdiv(B, tile_b)
    b_pad = n_tiles * tile_b
    if b_pad != B:
        x_flat = jnp.pad(x_flat, ((0, b_pad - B), (0, 0)))
        cls_rows = jnp.pad(cls_rows, (0, b_pad - B))
    cls_col = cls_rows.reshape(b_pad, 1)

    out = pl.pallas_call(
        disc_kernel,
        out_shape=jax.ShapeDtypeStruct((b_pad, 1), jnp.float32),
        grid=(n_tiles,),
        in_specs=[
            pl.BlockSpec((tile_b, IMG_FEATS), lambda i: (i, 0)),   # x tile (double-buffered)
            pl.BlockSpec((tile_b, 1), lambda i: (i, 0)),           # per-row class term
            pl.BlockSpec((1, IMG_FEATS), lambda i: (0, 0)),        # weight row (resident)
        ],
        out_specs=pl.BlockSpec((tile_b, 1), lambda i: (i, 0)),
        compiler_params=pltpu.CompilerParams(
            dimension_semantics=("parallel",),          # megacore on v7x
            vmem_limit_bytes=32 * 1024 * 1024,          # ~4.5 MiB actually needed
        ),
    )(x_flat, cls_col, w_img)

    # Match torch: sigmoid(l1(x.unsqueeze(1))) -> (B, 1, 1)
    return out[:B].reshape(B, 1, 1)


if __name__ == "__main__":
    key = jax.random.PRNGKey(0)
    k_x, k_c, k_e, k_w, k_b = jax.random.split(key, 5)

    def reference(x, c, emb_weight, lin_weight, lin_bias):
        B = x.shape[0]
        x_flat = x.reshape(B, -1)
        a = emb_weight[c]
        cat = jnp.concatenate([x_flat, a], axis=1)
        return jax.nn.sigmoid(cat @ lin_weight.T + lin_bias).reshape(B, 1, 1)

    # Deterministic parameter init (shapes from __init__):
    # nn.Embedding(nc, nc) ~ N(0, 1); nn.Linear(794, 1) ~ U(-1/sqrt(794), 1/sqrt(794)).
    emb_weight = jax.random.normal(k_e, (NC, NC), dtype=jnp.float32)
    bound = 1.0 / float((IMG_FEATS + NC) ** 0.5)
    lin_weight = jax.random.uniform(k_w, (1, IMG_FEATS + NC), jnp.float32, -bound, bound)
    lin_bias = jax.random.uniform(k_b, (1,), jnp.float32, -bound, bound)

    # Small test (B=2) plus a multi-tile test (B=600) exercising the grid + padding path.
    for B in (2, 600):
        kx, kc = jax.random.split(jax.random.fold_in(k_x, B))
        x = jax.random.normal(kx, (B, 1, 28, 28), dtype=jnp.float32)
        c = jax.random.randint(kc, (B,), 0, NC, dtype=jnp.int32)

        out = jax.block_until_ready(
            discriminator_forward(x, c, emb_weight, lin_weight, lin_bias))
        assert out.shape == (B, 1, 1), out.shape

        ref = reference(x, c, emb_weight, lin_weight, lin_bias)
        assert jnp.allclose(out, ref, atol=1e-5), (out.ravel()[:4], ref.ravel()[:4])

    print("KERNEL_OK")
</pallas_src>

<mosaic_0001>
module attributes {stable_mosaic.version = 11 : i64} {
  func.func @disc_kernel(%arg0: i32, %arg1: memref<8x784xf32, #tpu.memory_space<vmem>>, %arg2: memref<8x1xf32, #tpu.memory_space<vmem>>, %arg3: memref<1x784xf32, #tpu.memory_space<vmem>>, %arg4: memref<8x1xf32, #tpu.memory_space<vmem>>) attributes {dimension_semantics = [#tpu.dimension_semantics<parallel>], iteration_bounds = array<i64: 1>, scalar_prefetch = 0 : i64, scratch_operands = 0 : i64, tpu.core_type = #tpu.core_type<tc>, window_params = [{transform_indices = @transform_0, window_bounds = array<i64: 8, 784>}, {transform_indices = @transform_1, window_bounds = array<i64: 8, 1>}, {pipeline_mode = #tpu.pipeline_mode<synchronous>, transform_indices = @transform_2, window_bounds = array<i64: 1, 784>}, {transform_indices = @transform_3, window_bounds = array<i64: 8, 1>}]} {
    %c0 = arith.constant 0 : index
    %c0_0 = arith.constant 0 : index
    %0 = vector.load %arg1[%c0, %c0_0] : memref<8x784xf32, #tpu.memory_space<vmem>>, vector<8x784xf32>
    %c0_1 = arith.constant 0 : index
    %c0_2 = arith.constant 0 : index
    %1 = vector.load %arg3[%c0_1, %c0_2] : memref<1x784xf32, #tpu.memory_space<vmem>>, vector<1x784xf32>
    %2 = vector.broadcast %1 : vector<1x784xf32> to vector<8x784xf32>
    %3 = arith.mulf %0, %2 : vector<8x784xf32>
    %cst = arith.constant dense<0.000000e+00> : vector<8xf32>
    %4 = vector.multi_reduction <add>, %3, %cst [1] : vector<8x784xf32> to vector<8xf32>
    %5 = vector.shape_cast %4 : vector<8xf32> to vector<8x1xf32>
    %c0_3 = arith.constant 0 : index
    %c0_4 = arith.constant 0 : index
    %6 = vector.load %arg2[%c0_3, %c0_4] : memref<8x1xf32, #tpu.memory_space<vmem>>, vector<8x1xf32>
    %7 = arith.addf %5, %6 : vector<8x1xf32>
    %8 = arith.negf %7 : vector<8x1xf32>
    %9 = math.exp %8 : vector<8x1xf32>
    %cst_5 = arith.constant 1.000000e+00 : f32
    %10 = vector.broadcast %cst_5 : f32 to vector<8x1xf32>
    %11 = arith.addf %10, %9 : vector<8x1xf32>
    %12 = arith.divf %10, %11 : vector<8x1xf32>
    %c0_6 = arith.constant 0 : index
    %c0_7 = arith.constant 0 : index
    %13 = vector.load %arg4[%c0_6, %c0_7] : memref<8x1xf32, #tpu.memory_space<vmem>>, vector<8x1xf32>
    tpu.vector_store %arg4[%c0_6, %c0_7], %12 {strides = array<i32>} : memref<8x1xf32, #tpu.memory_space<vmem>>, vector<8x1xf32>,
    return
  }
  func.func @transform_0(%arg0: i32) -> (i32, i32) {
    %c0_i32 = arith.constant 0 : i32
    %c0_i32_0 = arith.constant 0 : i32
    return %arg0, %c0_i32 : i32, i32
  }
  func.func @transform_1(%arg0: i32) -> (i32, i32) {
    %c0_i32 = arith.constant 0 : i32
    %c0_i32_0 = arith.constant 0 : i32
    return %arg0, %c0_i32 : i32, i32
  }
  func.func @transform_2(%arg0: i32) -> (i32, i32) {
    %c0_i32 = arith.constant 0 : i32
    %c0_i32_0 = arith.constant 0 : i32
    %c0_i32_1 = arith.constant 0 : i32
    return %c0_i32, %c0_i32_0 : i32, i32
  }
  func.func @transform_3(%arg0: i32) -> (i32, i32) {
    %c0_i32 = arith.constant 0 : i32
    %c0_i32_0 = arith.constant 0 : i32
    return %arg0, %c0_i32 : i32, i32
  }
}

</mosaic_0001>

<bundles_post_ra>
// kernel: discriminator_forward.1
= control target key start
LH: loop header
LB: loop body
LE: loop exit
PB: predicated region body
PF: predicated region fallthrough
CT: control target
= control target key end

     0   :  { %v23_v0 = vlaneseq  ;;  %vm70_vm0 = vcmask 130048   ;;  %vm83_vm1 = vcmask 7168   ;;  %s144_s2 = inlined_call_operand.vmem [shape: f32[1,784], index: 2, kind: input, shape index: {}]   ;;  %s145_s0 = inlined_call_operand.vmem [shape: f32[8,784], index: 0, kind: input, shape index: {}]   ;;  %s146_s1 = inlined_call_operand.vmem [shape: f32[8,1], index: 1, kind: input, shape index: {}]   ;;  %s147_s3 = inlined_call_operand.vmem [shape: f32[8,1], index: 3, kind: output, shape index: {}]  }
   0x1   :  { %v21_v2 = vld [vmem:[%s144_s2] sm:$0x7f]  ;;  %v15_v8 = vld [vmem:[%s145_s0 + $0x8] sm:$0xff]  ;;  %v16_v9 = vld [vmem:[%s145_s0 + $0x10] sm:$0xff] }
   0x2   :  { %v24_v1 = vshrl.u32 %v23_v0, 7  ;;  %v14_v7 = vld [vmem:[%s145_s0] sm:$0xff]  ;;  %v17_v17 = vld [vmem:[%s145_s0 + $0x18] sm:$0xff]  ;;  %v20_v24 = vld [vmem:[%s145_s0 + $0x30] sm:$0xff] }
   0x3   :  { %v18_v22 = vld [vmem:[%s145_s0 + $0x20] sm:$0xff]  ;;  %v19_v28 = vld [vmem:[%s145_s0 + $0x28] sm:$0xff] }
   0x4   :  { %v25_v3 = vsub.s32 0, %v24_v1  ;;  %v29_v4 = vsub.s32 1, %v24_v1  ;;  %v33_v5 = vsub.s32 2, %v24_v1  ;;  %v37_v6 = vsub.s32 3, %v24_v1  ;;  %v75_v38 = vld [vmem:[%s146_s1] sm:$0xff] }
   0x5   :  { %v41_v10 = vsub.s32 4, %v24_v1  ;;  %v45_v11 = vsub.s32 5, %v24_v1  ;;  %v49_v12 = vsub.s32 6, %v24_v1 }
   0x6   :  { %v26_v13 = vrot.slane %v21_v2, %v25_v3  ;;  %v30_v14 = vrot.slane %v21_v2, %v29_v4  ;;  %v34_v15 = vrot.slane %v21_v2, %v33_v5  ;;  %v38_v16 = vrot.slane %v21_v2, %v37_v6 }
   0x7   :  { %v42_v18 = vrot.slane %v21_v2, %v41_v10  ;;  %v50_v23 = vrot.slane %v21_v2, %v49_v12  ;;  %v46_v25 = vrot.slane %v21_v2, %v45_v11 }
   0x8   :  { %v58_v19 = vmul.f32 %v26_v13, %v14_v7  ;;  %v59_v20 = vmul.f32 %v30_v14, %v15_v8  ;;  %v60_v21 = vmul.f32 %v34_v15, %v16_v9  ;;  %v61_v26 = vmul.f32 %v38_v16, %v17_v17 }
   0x9   :  { %v62_v29 = vmul.f32 %v42_v18, %v18_v22  ;;  %v64_v31 = vmul.f32 %v50_v23, %v20_v24  ;;  %v63_v32 = vmul.f32 %v46_v25, %v19_v28 }
   0xa   :  { %v65_v27 = vadd.f32 %v59_v20, %v58_v19 }
   0xb   :  { %v71_v35 = vsel %vm70_vm0, %v64_v31, 0.0 }
   0xc   :  { %v66_v30 = vadd.f32 %v65_v27, %v60_v21 }
   0xe   :  { %v67_v33 = vadd.f32 %v66_v30, %v61_v26 }
  0x10   :  { %v68_v34 = vadd.f32 %v67_v33, %v62_v29 }
  0x12   :  { %v69_v36 = vadd.f32 %v68_v34, %v63_v32 }
  0x14   :  { %v72_v37 = vadd.f32 %v71_v35, %v69_v36 }
  0x16   :  { %73 = vadd.xlane.f32.xlu0 %v72_v37 }
  0xa3   :  { %v74_v39 = vpop.xlane.xlu0 %73 }
  0xa4   :  { %v76_v40 = vadd.f32 %v75_v38, %v74_v39 }
  0xa6   :  { %v89_v41 = vmul.f32 -1.442695, %v76_v40 }
  0xa8   :  { %90 = vpow2.f32 %v89_v41 }
  0xb2   :  { %v91_v42 = vpop.eup %90 }
  0xb3   :  { %v80_v43 = vadd.f32 1.0, %v91_v42 }
  0xb5   :  { %92 = vrcp.f32 %v80_v43 }
  0xbf   :  { %v93_v44 = vpop.eup %92 }
  0xc0   :  { %84 = vst.msk [vmem:[%s147_s3] sm:$0xff] %vm83_vm1, %v93_v44 }

</bundles_post_ra>
